<compile_context>
chip_gen: v6e
topology: v6e:2x2x1
jax: 0.10.0
libtpu: 0.0.40
codegen_flags: <defaults>
</compile_context>

<pallas_src>
import math

import jax
import jax.numpy as jnp
from jax.experimental import pallas as pl
from jax.experimental.pallas import tpu as pltpu

EPS = 1e-5


def _gc_block_kernel(x_ref, w1_ref, a1_ref, g1_ref, be1_ref,
                     w2_ref, a2_ref, g2_ref, be2_ref, o_ref):
    N = a1_ref.shape[0]
    BN, F = x_ref.shape
    B = BN // N
    inv_b = 1.0 / B

    x_flat = x_ref[...]                                   # (B*N, F)
    w1 = w1_ref[...]
    a1 = a1_ref[...]
    g1 = g1_ref[...]
    be1 = be1_ref[...]
    w2 = w2_ref[...]
    a2 = a2_ref[...]
    g2 = g2_ref[...]
    be2 = be2_ref[...]

    def graph_conv(h_flat, w, att):
        # One MXU matmul for h@W across the whole batch, then one att matmul
        # with all batch elements concatenated along the lane axis.
        # (Bias intentionally omitted: cancelled by the training-mode BN mean.)
        s = jnp.dot(h_flat, w, preferred_element_type=jnp.float32)   # (B*N, F)
        s_cat = jnp.concatenate(
            [s[b * N:(b + 1) * N, :] for b in range(B)], axis=1)     # (N, B*F)
        y_cat = jnp.dot(att, s_cat, preferred_element_type=jnp.float32)
        # back to B per-batch (N, F) tiles (static lane slices)
        return [y_cat[:, b * F:(b + 1) * F] for b in range(B)]

    def bn_tanh(ys, gamma, beta):
        # Training-mode BatchNorm1d over the batch axis (per flattened (n,f)
        # feature, biased variance), folded into scale/shift, then tanh.
        s_acc = ys[0]
        sq_acc = ys[0] * ys[0]
        for b in range(1, B):
            s_acc = s_acc + ys[b]
            sq_acc = sq_acc + ys[b] * ys[b]
        mean = s_acc * inv_b                                  # (N, F)
        var = jnp.maximum(sq_acc * inv_b - mean * mean, 0.0)  # (N, F)
        scale = jax.lax.rsqrt(var + EPS) * gamma              # (N, F)
        shift = beta - mean * scale                           # (N, F)
        return [jnp.tanh(y * scale + shift) for y in ys]      # B x (N, F)

    # ---- gc1 -> bn1 -> tanh -> (dropout = identity) ----
    h1 = bn_tanh(graph_conv(x_flat, w1, a1), g1, be1)
    h1_flat = jnp.concatenate(h1, axis=0)                     # (B*N, F)

    # ---- gc2 -> bn2 -> tanh -> (dropout = identity) ----
    h2 = bn_tanh(graph_conv(h1_flat, w2, a2), g2, be2)

    # ---- residual + single full-tile store ----
    o_ref[...] = jnp.concatenate(h2, axis=0) + x_flat


def gc_block_forward(x, w1, att1, b1, g1, be1, w2, att2, b2, g2, be2):
    # b1/b2 are accepted for parameter parity with the PyTorch module but are
    # NOT sent to the kernel: under training-mode BatchNorm the per-feature
    # bias added identically to every batch element is exactly cancelled by
    # the batch-mean subtraction, so omitting it is numerically identical and
    # saves two input DMAs plus 2*B broadcast-adds.
    del b1, b2
    B, N, F = x.shape
    x_flat = x.reshape(B * N, F)                  # free contiguous reshape

    flops = 4 * B * N * F * (N + F)               # 2 layers x 2 matmuls, 2 flops/MAC
    transcendentals = 2 * B * N * F + 2 * N * F   # tanh passes + rsqrt
    bytes_accessed = 4 * (2 * x.size + w1.size + att1.size + g1.size + be1.size
                          + w2.size + att2.size + g2.size + be2.size)

    vmem = pl.BlockSpec(memory_space=pltpu.MemorySpace.VMEM)
    out_flat = pl.pallas_call(
        _gc_block_kernel,
        out_shape=jax.ShapeDtypeStruct((B * N, F), jnp.float32),
        in_specs=[vmem] * 9,
        out_specs=vmem,
        cost_estimate=pl.CostEstimate(
            flops=flops,
            transcendentals=transcendentals,
            bytes_accessed=bytes_accessed,
        ),
    )(x_flat, w1, att1, g1, be1, w2, att2, g2, be2)
    return out_flat.reshape(B, N, F)


def _reference(x, w1, att1, b1, g1, be1, w2, att2, b2, g2, be2):
    B, N, F = x.shape

    def gc(inp, w, att, b):
        s = jnp.einsum('bnf,fg->bng', inp, w)
        return jnp.einsum('nm,bmg->bng', att, s) + b

    def bn(y, g, be):
        yf = y.reshape(B, -1)
        m = yf.mean(axis=0)
        v = yf.var(axis=0)  # biased, matches torch BN training-mode normalization
        yf = (yf - m) / jnp.sqrt(v + EPS) * g.reshape(-1) + be.reshape(-1)
        return yf.reshape(B, N, F)

    y = jnp.tanh(bn(gc(x, w1, att1, b1), g1, be1))
    y = jnp.tanh(bn(gc(y, w2, att2, b2), g2, be2))
    return y + x


if __name__ == "__main__":
    batch, node_n, in_features = 2, 48, 16
    stdv = 1.0 / math.sqrt(in_features)

    key = jax.random.PRNGKey(0)
    keys = jax.random.split(key, 8)

    x = jax.random.normal(keys[0], (batch, node_n, in_features), dtype=jnp.float32)

    # GraphConvolution params (uniform(-stdv, stdv), as in reset_parameters)
    w1 = jax.random.uniform(keys[1], (in_features, in_features), jnp.float32, -stdv, stdv)
    att1 = jax.random.uniform(keys[2], (node_n, node_n), jnp.float32, -stdv, stdv)
    b1 = jax.random.uniform(keys[3], (1, in_features), jnp.float32, -stdv, stdv)
    w2 = jax.random.uniform(keys[4], (in_features, in_features), jnp.float32, -stdv, stdv)
    att2 = jax.random.uniform(keys[5], (node_n, node_n), jnp.float32, -stdv, stdv)
    b2 = jax.random.uniform(keys[6], (1, in_features), jnp.float32, -stdv, stdv)

    # BatchNorm1d affine params: PyTorch default init weight=1, bias=0,
    # stored flat (node_n*in_features,) and reshaped to (node_n, in_features).
    g1 = jnp.ones((node_n, in_features), jnp.float32)
    be1 = jnp.zeros((node_n, in_features), jnp.float32)
    g2 = jnp.ones((node_n, in_features), jnp.float32)
    be2 = jnp.zeros((node_n, in_features), jnp.float32)

    out = gc_block_forward(x, w1, att1, b1, g1, be1, w2, att2, b2, g2, be2)
    out = jax.block_until_ready(out)

    ref = _reference(x, w1, att1, b1, g1, be1, w2, att2, b2, g2, be2)
    assert out.shape == (batch, node_n, in_features)
    assert jnp.allclose(out, ref, atol=1e-2, rtol=1e-2), "mismatch vs reference"

    print("KERNEL_OK")
</pallas_src>

<mosaic_0001>
module attributes {stable_mosaic.version = 11 : i64} {
  func.func @_gc_block_kernel(%arg0: memref<96x16xf32, #tpu.memory_space<vmem>>, %arg1: memref<16x16xf32, #tpu.memory_space<vmem>>, %arg2: memref<48x48xf32, #tpu.memory_space<vmem>>, %arg3: memref<48x16xf32, #tpu.memory_space<vmem>>, %arg4: memref<48x16xf32, #tpu.memory_space<vmem>>, %arg5: memref<16x16xf32, #tpu.memory_space<vmem>>, %arg6: memref<48x48xf32, #tpu.memory_space<vmem>>, %arg7: memref<48x16xf32, #tpu.memory_space<vmem>>, %arg8: memref<48x16xf32, #tpu.memory_space<vmem>>, %arg9: memref<96x16xf32, #tpu.memory_space<vmem>>) attributes {dimension_semantics = [], scalar_prefetch = 0 : i64, scratch_operands = 0 : i64, tpu.core_type = #tpu.core_type<tc>} {
    %c0 = arith.constant 0 : index
    %c0_0 = arith.constant 0 : index
    %0 = vector.load %arg0[%c0, %c0_0] : memref<96x16xf32, #tpu.memory_space<vmem>>, vector<96x16xf32>
    %c0_1 = arith.constant 0 : index
    %c0_2 = arith.constant 0 : index
    %1 = vector.load %arg1[%c0_1, %c0_2] : memref<16x16xf32, #tpu.memory_space<vmem>>, vector<16x16xf32>
    %c0_3 = arith.constant 0 : index
    %c0_4 = arith.constant 0 : index
    %2 = vector.load %arg2[%c0_3, %c0_4] : memref<48x48xf32, #tpu.memory_space<vmem>>, vector<48x48xf32>
    %c0_5 = arith.constant 0 : index
    %c0_6 = arith.constant 0 : index
    %3 = vector.load %arg3[%c0_5, %c0_6] : memref<48x16xf32, #tpu.memory_space<vmem>>, vector<48x16xf32>
    %c0_7 = arith.constant 0 : index
    %c0_8 = arith.constant 0 : index
    %4 = vector.load %arg4[%c0_7, %c0_8] : memref<48x16xf32, #tpu.memory_space<vmem>>, vector<48x16xf32>
    %c0_9 = arith.constant 0 : index
    %c0_10 = arith.constant 0 : index
    %5 = vector.load %arg5[%c0_9, %c0_10] : memref<16x16xf32, #tpu.memory_space<vmem>>, vector<16x16xf32>
    %c0_11 = arith.constant 0 : index
    %c0_12 = arith.constant 0 : index
    %6 = vector.load %arg6[%c0_11, %c0_12] : memref<48x48xf32, #tpu.memory_space<vmem>>, vector<48x48xf32>
    %c0_13 = arith.constant 0 : index
    %c0_14 = arith.constant 0 : index
    %7 = vector.load %arg7[%c0_13, %c0_14] : memref<48x16xf32, #tpu.memory_space<vmem>>, vector<48x16xf32>
    %c0_15 = arith.constant 0 : index
    %c0_16 = arith.constant 0 : index
    %8 = vector.load %arg8[%c0_15, %c0_16] : memref<48x16xf32, #tpu.memory_space<vmem>>, vector<48x16xf32>
    %cst = arith.constant dense<0.000000e+00> : vector<96x16xf32>
    %9 = tpu.matmul %0, %1, %cst {dimension_numbers = #tpu.dot_dimension_numbers<[1], [0], [0], [1], [0, 0, 1, 1], [], []>} : vector<96x16xf32>, vector<16x16xf32>, vector<96x16xf32> -> vector<96x16xf32>
    %10 = vector.extract_strided_slice %9 {offsets = [0, 0], sizes = [48, 16], strides = [1, 1]} : vector<96x16xf32> to vector<48x16xf32>
    %11 = vector.extract_strided_slice %9 {offsets = [48, 0], sizes = [48, 16], strides = [1, 1]} : vector<96x16xf32> to vector<48x16xf32>
    %12 = tpu.concatenate %10, %11 in 1 : vector<48x16xf32>, vector<48x16xf32> -> vector<48x32xf32>
    %cst_17 = arith.constant dense<0.000000e+00> : vector<48x32xf32>
    %13 = tpu.matmul %2, %12, %cst_17 {dimension_numbers = #tpu.dot_dimension_numbers<[1], [0], [0], [1], [0, 0, 1, 1], [], []>} : vector<48x48xf32>, vector<48x32xf32>, vector<48x32xf32> -> vector<48x32xf32>
    %14 = vector.extract_strided_slice %13 {offsets = [0, 0], sizes = [48, 16], strides = [1, 1]} : vector<48x32xf32> to vector<48x16xf32>
    %15 = vector.extract_strided_slice %13 {offsets = [0, 16], sizes = [48, 16], strides = [1, 1]} : vector<48x32xf32> to vector<48x16xf32>
    %16 = arith.mulf %14, %14 : vector<48x16xf32>
    %17 = arith.addf %14, %15 : vector<48x16xf32>
    %18 = arith.mulf %15, %15 : vector<48x16xf32>
    %19 = arith.addf %16, %18 : vector<48x16xf32>
    %cst_18 = arith.constant 5.000000e-01 : f32
    %20 = vector.broadcast %cst_18 : f32 to vector<48x16xf32>
    %21 = arith.mulf %17, %20 : vector<48x16xf32>
    %cst_19 = arith.constant 5.000000e-01 : f32
    %22 = vector.broadcast %cst_19 : f32 to vector<48x16xf32>
    %23 = arith.mulf %19, %22 : vector<48x16xf32>
    %24 = arith.mulf %21, %21 : vector<48x16xf32>
    %25 = arith.subf %23, %24 : vector<48x16xf32>
    %cst_20 = arith.constant 0.000000e+00 : f32
    %26 = vector.broadcast %cst_20 : f32 to vector<48x16xf32>
    %27 = arith.maximumf %25, %26 : vector<48x16xf32>
    %cst_21 = arith.constant 9.99999974E-6 : f32
    %28 = vector.broadcast %cst_21 : f32 to vector<48x16xf32>
    %29 = arith.addf %27, %28 : vector<48x16xf32>
    %30 = math.rsqrt %29 : vector<48x16xf32>
    %31 = arith.mulf %30, %3 : vector<48x16xf32>
    %32 = arith.mulf %21, %31 : vector<48x16xf32>
    %33 = arith.subf %4, %32 : vector<48x16xf32>
    %34 = arith.mulf %14, %31 : vector<48x16xf32>
    %35 = arith.addf %34, %33 : vector<48x16xf32>
    %36 = math.tanh %35 : vector<48x16xf32>
    %37 = arith.mulf %15, %31 : vector<48x16xf32>
    %38 = arith.addf %37, %33 : vector<48x16xf32>
    %39 = math.tanh %38 : vector<48x16xf32>
    %40 = tpu.concatenate %36, %39 in 0 : vector<48x16xf32>, vector<48x16xf32> -> vector<96x16xf32>
    %cst_22 = arith.constant dense<0.000000e+00> : vector<96x16xf32>
    %41 = tpu.matmul %40, %5, %cst_22 {dimension_numbers = #tpu.dot_dimension_numbers<[1], [0], [0], [1], [0, 0, 1, 1], [], []>} : vector<96x16xf32>, vector<16x16xf32>, vector<96x16xf32> -> vector<96x16xf32>
    %42 = vector.extract_strided_slice %41 {offsets = [0, 0], sizes = [48, 16], strides = [1, 1]} : vector<96x16xf32> to vector<48x16xf32>
    %43 = vector.extract_strided_slice %41 {offsets = [48, 0], sizes = [48, 16], strides = [1, 1]} : vector<96x16xf32> to vector<48x16xf32>
    %44 = tpu.concatenate %42, %43 in 1 : vector<48x16xf32>, vector<48x16xf32> -> vector<48x32xf32>
    %cst_23 = arith.constant dense<0.000000e+00> : vector<48x32xf32>
    %45 = tpu.matmul %6, %44, %cst_23 {dimension_numbers = #tpu.dot_dimension_numbers<[1], [0], [0], [1], [0, 0, 1, 1], [], []>} : vector<48x48xf32>, vector<48x32xf32>, vector<48x32xf32> -> vector<48x32xf32>
    %46 = vector.extract_strided_slice %45 {offsets = [0, 0], sizes = [48, 16], strides = [1, 1]} : vector<48x32xf32> to vector<48x16xf32>
    %47 = vector.extract_strided_slice %45 {offsets = [0, 16], sizes = [48, 16], strides = [1, 1]} : vector<48x32xf32> to vector<48x16xf32>
    %48 = arith.mulf %46, %46 : vector<48x16xf32>
    %49 = arith.addf %46, %47 : vector<48x16xf32>
    %50 = arith.mulf %47, %47 : vector<48x16xf32>
    %51 = arith.addf %48, %50 : vector<48x16xf32>
    %cst_24 = arith.constant 5.000000e-01 : f32
    %52 = vector.broadcast %cst_24 : f32 to vector<48x16xf32>
    %53 = arith.mulf %49, %52 : vector<48x16xf32>
    %cst_25 = arith.constant 5.000000e-01 : f32
    %54 = vector.broadcast %cst_25 : f32 to vector<48x16xf32>
    %55 = arith.mulf %51, %54 : vector<48x16xf32>
    %56 = arith.mulf %53, %53 : vector<48x16xf32>
    %57 = arith.subf %55, %56 : vector<48x16xf32>
    %cst_26 = arith.constant 0.000000e+00 : f32
    %58 = vector.broadcast %cst_26 : f32 to vector<48x16xf32>
    %59 = arith.maximumf %57, %58 : vector<48x16xf32>
    %cst_27 = arith.constant 9.99999974E-6 : f32
    %60 = vector.broadcast %cst_27 : f32 to vector<48x16xf32>
    %61 = arith.addf %59, %60 : vector<48x16xf32>
    %62 = math.rsqrt %61 : vector<48x16xf32>
    %63 = arith.mulf %62, %7 : vector<48x16xf32>
    %64 = arith.mulf %53, %63 : vector<48x16xf32>
    %65 = arith.subf %8, %64 : vector<48x16xf32>
    %66 = arith.mulf %46, %63 : vector<48x16xf32>
    %67 = arith.addf %66, %65 : vector<48x16xf32>
    %68 = math.tanh %67 : vector<48x16xf32>
    %69 = arith.mulf %47, %63 : vector<48x16xf32>
    %70 = arith.addf %69, %65 : vector<48x16xf32>
    %71 = math.tanh %70 : vector<48x16xf32>
    %72 = tpu.concatenate %68, %71 in 0 : vector<48x16xf32>, vector<48x16xf32> -> vector<96x16xf32>
    %73 = arith.addf %72, %0 : vector<96x16xf32>
    %c0_28 = arith.constant 0 : index
    %c0_29 = arith.constant 0 : index
    %74 = vector.load %arg9[%c0_28, %c0_29] : memref<96x16xf32, #tpu.memory_space<vmem>>, vector<96x16xf32>
    tpu.vector_store %arg9[%c0_28, %c0_29], %73 {strides = array<i32>} : memref<96x16xf32, #tpu.memory_space<vmem>>, vector<96x16xf32>,
    return
  }
}

</mosaic_0001>

<bundles_post_ra>
// kernel: tpu_custom_call.1
= control target key start
LH: loop header
LB: loop body
LE: loop exit
PB: predicated region body
PF: predicated region fallthrough
CT: control target
= control target key end

     0   :  { %vm84_vm0 = vcmask 130048   ;;  %s1438_s15 = smov 16   ;;  %vm276_vm1 = vcmask 392192   ;;  %s1439_s27 = smov 112   ;;  %s2006_s1 = inlined_call_operand.vmem [shape: f32[16,16], index: 1, kind: input, shape index: {}]   ;;  %s2007_s0 = inlined_call_operand.vmem [shape: f32[96,16], index: 0, kind: input, shape index: {}]   ;;  %s2008_s2 = inlined_call_operand.vmem [shape: f32[48,48], index: 2, kind: input, shape index: {}]   ;;  %s2009_s5 = inlined_call_operand.vmem [shape: f32[16,16], index: 5, kind: input, shape index: {}]   ;;  %s2010_s3 = inlined_call_operand.vmem [shape: f32[48,16], index: 3, kind: input, shape index: {}]   ;;  %s2011_s4 = inlined_call_operand.vmem [shape: f32[48,16], index: 4, kind: input, shape index: {}]   ;;  %s2012_s6 = inlined_call_operand.vmem [shape: f32[48,48], index: 6, kind: input, shape index: {}]   ;;  %s2013_s7 = inlined_call_operand.vmem [shape: f32[48,16], index: 7, kind: input, shape index: {}]   ;;  %s2014_s8 = inlined_call_operand.vmem [shape: f32[48,16], index: 8, kind: input, shape index: {}]   ;;  %s2015_s9 = inlined_call_operand.vmem [shape: f32[96,16], index: 9, kind: output, shape index: {}]  }
   0x1   :  { %v45_v0 = vld [vmem:[%s2006_s1 + $0x8] sm:$0xff]  ;;  %v44_v1 = vld [vmem:[%s2006_s1] sm:$0xff]  ;;  %v34_v4 = vld [vmem:[%s2007_s0 + $0x10] sm:$0xff] }
   0x2   :  { %v32_v2 = vld [vmem:[%s2007_s0] sm:$0xff]  ;;  %1266 = vmatprep.subr.mxu0 %v45_v0  ;;  %v33_v3 = vld [vmem:[%s2007_s0 + $0x8] sm:$0xff]  ;;  %v35_v5 = vld [vmem:[%s2007_s0 + $0x18] sm:$0xff] }
   0x3   :  { %1270 = vmatprep.mubr.msk.f32.mxu0 %vm84_vm0, %v32_v2  ;;  %1267 = vmatpush3.msra.mxu0 %v45_v0  ;;  %v36_v6 = vld [vmem:[%s2007_s0 + $0x20] sm:$0xff]  ;;  %v37_v7 = vld [vmem:[%s2007_s0 + $0x28] sm:$0xff]  ;;  %v38_v8 = vld [vmem:[%s2007_s0 + $0x30] sm:$0xff] }
   0x4   :  { %1268 = vmatprep.subr.mxu0 %v44_v1  ;;  %v39_v9 = vld [vmem:[%s2007_s0 + $0x38] sm:$0xff]  ;;  %v40_v10 = vld [vmem:[%s2007_s0 + $0x40] sm:$0xff]  ;;  %v41_v11 = vld [vmem:[%s2007_s0 + $0x48] sm:$0xff] }
   0x5   :  { %1269 = vmatpush3.msra.mxu0 %v44_v1  ;;  %v42_v12 = vld [vmem:[%s2007_s0 + $0x50] sm:$0xff]  ;;  %v43_v13 = vld [vmem:[%s2007_s0 + $0x58] sm:$0xff]  ;;  %v46_v25 = vld [vmem:[%s2008_s2] sm:$0xff] }
   0x6   :  { %1271 = vmatmul.mubr.msk.f32.vlgmr.msra.gmra.mxu0 %vm84_vm0, %v33_v3  ;;  %1300 = vmatprep.mubr.msk.f32.mxu1 %vm276_vm1, %v46_v25  ;;  %v47_v39 = vld [vmem:[%s2008_s2 + $0x8] sm:$0xff]  ;;  %v48_v40 = vld [vmem:[%s2008_s2 + $0x10] sm:$0xff]  ;;  %v49_v41 = vld [vmem:[%s2008_s2 + $0x18] sm:$0xff] }
   0x7   :  { %1273 = vmatprep.mubr.msk.f32.mxu0 %vm84_vm0, %v34_v4  ;;  %v50_v42 = vld [vmem:[%s2008_s2 + $0x20] sm:$0xff]  ;;  %v51_v43 = vld [vmem:[%s2008_s2 + $0x28] sm:$0xff] }
   0x8   :  { %v65_v56 = vld [vmem:[%s2009_s5 + $0x8] sm:$0xff]  ;;  %v64_v57 = vld [vmem:[%s2009_s5] sm:$0xff] }
   0xa   :  { %1274 = vmatmul.mubr.msk.f32.gmra.mxu0 %vm84_vm0, %v35_v5 }
   0xb   :  { %1276 = vmatprep.mubr.msk.f32.mxu0 %vm84_vm0, %v36_v6 }
   0xe   :  { %1277 = vmatmul.mubr.msk.f32.gmra.mxu0 %vm84_vm0, %v37_v7 }
   0xf   :  { %1279 = vmatprep.mubr.msk.f32.mxu0 %vm84_vm0, %v38_v8 }
  0x12   :  { %1280 = vmatmul.mubr.msk.f32.gmra.mxu0 %vm84_vm0, %v39_v9 }
  0x13   :  { %1282 = vmatprep.mubr.msk.f32.mxu0 %vm84_vm0, %v40_v10 }
  0x16   :  { %1283 = vmatmul.mubr.msk.f32.gmra.mxu0 %vm84_vm0, %v41_v11 }
  0x17   :  { %1285 = vmatprep.mubr.msk.f32.mxu0 %vm84_vm0, %v42_v12 }
  0x1a   :  { %1286 = vmatmul.mubr.msk.f32.gmra.mxu0 %vm84_vm0, %v43_v13 }
  0xc6   :  { %v1272_v14 = vpop.f32.mrf.mxu0 }
  0xc8   :  { %v187_v15 = vpop.f32.mrf.mxu0 }
  0xca   :  { %v1275_v16 = vpop.f32.mrf.mxu0 }
  0xcc   :  { %v197_v17 = vpop.f32.mrf.mxu0 }
  0xce   :  { %v1278_v18 = vpop.f32.mrf.mxu0 }
  0xd0   :  { %v207_v19 = vpop.f32.mrf.mxu0 }
  0xd2   :  { %v1281_v20 = vpop.f32.mrf.mxu0 }
  0xd4   :  { %v217_v21 = vpop.f32.mrf.mxu0 }
  0xd6   :  { %v1284_v22 = vpop.f32.mrf.mxu0 }
  0xd7   :  { %258 = vrot.lane.b32.xlu1 %v1284_v22, %s1438_s15 }
  0xd8   :  { %v227_v23 = vpop.f32.mrf.mxu0 }
  0xda   :  { %v1287_v24 = vpop.f32.mrf.mxu0 }
  0xdb   :  { %256 = vrot.lane.b32.xlu1 %v227_v23, %s1438_s15  ;;  %262 = vrot.lane.b32.xlu0 %v1287_v24, %s1438_s15 }
  0xdc   :  { %v237_v26 = vpop.f32.mrf.mxu0 }
  0xdf   :  { %252 = vrot.lane.b32.xlu1 %v217_v21, %s1438_s15  ;;  %260 = vrot.lane.b32.xlu0 %v237_v26, %s1438_s15 }
  0xe3   :  { %254 = vrot.lane.b32.xlu0 %v1281_v20, %s1438_s15 }
 0x149   :  { %v259_v27 = vpop.permute.xlu1 %258 }
 0x14a   :  { %v273_v33 = vsel %vm84_vm0, %v1275_v16, %v259_v27 }
 0x14d   :  { %v263_v28 = vpop.permute.xlu0 %262  ;;  %v257_v30 = vpop.permute.xlu1 %256 }
 0x14e   :  { %v275_v29 = vsel %vm84_vm0, %v1278_v18, %v263_v28  ;;  %v272_v35 = vsel %vm84_vm0, %v197_v17, %v257_v30 }
 0x14f   :  { %1288 = vmatprep.subr.mxu1 %v275_v29 }
 0x150   :  { %1289 = vmatpush3.msra.mxu1 %v275_v29 }
 0x151   :  { %v261_v31 = vpop.permute.xlu0 %260  ;;  %v253_v36 = vpop.permute.xlu1 %252 }
 0x152   :  { %v274_v32 = vsel %vm84_vm0, %v207_v19, %v261_v31  ;;  %v270_v38 = vsel %vm84_vm0, %v187_v15, %v253_v36 }
 0x153   :  { %1290 = vmatprep.subr.mxu1 %v274_v32 }
 0x154   :  { %1291 = vmatpush3.msra.mxu1 %v274_v32 }
 0x155   :  { %1292 = vmatprep.subr.mxu1 %v273_v33  ;;  %v255_v34 = vpop.permute.xlu0 %254 }
 0x156   :  { %1293 = vmatpush3.msra.mxu1 %v273_v33  ;;  %v271_v37 = vsel %vm84_vm0, %v1272_v14, %v255_v34 }
 0x157   :  { %1294 = vmatprep.subr.mxu1 %v272_v35 }
 0x158   :  { %1295 = vmatpush3.msra.mxu1 %v272_v35 }
 0x159   :  { %1296 = vmatprep.subr.mxu1 %v271_v37 }
 0x15a   :  { %1297 = vmatpush3.msra.mxu1 %v271_v37 }
 0x15b   :  { %1298 = vmatprep.subr.mxu1 %v270_v38 }
 0x15c   :  { %1299 = vmatpush3.msra.mxu1 %v270_v38 }
 0x15d   :  { %1301 = vmatmul.mubr.msk.f32.vlgmr.msra.gmra.mxu1 %vm276_vm1, %v47_v39  ;;  %1309 = vmatprep.subr.mxu1 %v65_v56 }
 0x15e   :  { %1303 = vmatprep.mubr.msk.f32.mxu1 %vm276_vm1, %v48_v40  ;;  %1310 = vmatpush3.msra.mxu1 %v65_v56 }
 0x15f   :  { %1311 = vmatprep.subr.mxu1 %v64_v57 }
 0x160   :  { %1312 = vmatpush3.msra.mxu1 %v64_v57  ;;  %v53_v57 = vld [vmem:[%s2010_s3 + $0x8] sm:$0xff] }
 0x161   :  { %1304 = vmatmul.mubr.msk.f32.gmra.mxu1 %vm276_vm1, %v49_v41 }
 0x162   :  { %1306 = vmatprep.mubr.msk.f32.mxu1 %vm276_vm1, %v50_v42 }
 0x165   :  { %1307 = vmatmul.mubr.msk.f32.gmra.mxu1 %vm276_vm1, %v51_v43 }
 0x21d   :  { %v1580_v44 = vpop.f32.mrf.mxu1 }
 0x21e   :  { %404 = vrot.lane.b32.xlu1 %v1580_v44, %s1439_s27  ;;  %v391_v46 = vmul.f32 %v1580_v44, %v1580_v44 }
 0x21f   :  { %v1584_v45 = vpop.f32.mrf.mxu1 }
 0x220   :  { %402 = vrot.lane.b32.xlu0 %v1584_v45, %s1439_s27  ;;  %v390_v47 = vmul.f32 %v1584_v45, %v1584_v45 }
 0x221   :  { %v1593_v48 = vpop.f32.mrf.mxu1 }
 0x222   :  { %434 = vrot.lane.b32.xlu1 %v391_v46, %s1439_s27  ;;  %v393_v50 = vmul.f32 %v1593_v48, %v1593_v48 }
 0x223   :  { %v1598_v49 = vpop.f32.mrf.mxu1 }
 0x224   :  { %432 = vrot.lane.b32.xlu0 %v390_v47, %s1439_s27  ;;  %v392_v51 = vmul.f32 %v1598_v49, %v1598_v49 }
 0x225   :  { %v1607_v52 = vpop.f32.mrf.mxu1 }
 0x226   :  { %408 = vrot.lane.b32.xlu1 %v1593_v48, %s1439_s27  ;;  %v395_v54 = vmul.f32 %v1607_v52, %v1607_v52 }
 0x227   :  { %v1612_v53 = vpop.f32.mrf.mxu1 }
 0x228   :  { %406 = vrot.lane.b32.xlu0 %v1598_v49, %s1439_s27  ;;  %v394_v55 = vmul.f32 %v1612_v53, %v1612_v53 }
 0x22a   :  { %438 = vrot.lane.b32.xlu1 %v393_v50, %s1439_s27 }
 0x22c   :  { %436 = vrot.lane.b32.xlu0 %v392_v51, %s1439_s27 }
 0x22e   :  { %412 = vrot.lane.b32.xlu1 %v1607_v52, %s1439_s27 }
 0x230   :  { %410 = vrot.lane.b32.xlu0 %v1612_v53, %s1439_s27 }
 0x232   :  { %442 = vrot.lane.b32.xlu1 %v395_v54, %s1439_s27 }
 0x234   :  { %440 = vrot.lane.b32.xlu0 %v394_v55, %s1439_s27 }
 0x290   :  { %v405_v58 = vpop.permute.xlu1 %404 }
 0x291   :  { %v421_v59 = vadd.f32 %v1580_v44, %v405_v58 }
 0x292   :  { %v403_v60 = vpop.permute.xlu0 %402 }
 0x293   :  { %v1629_v61 = vmul.f32 0.5, %v421_v59  ;;  %v420_v62 = vadd.f32 %v403_v60, %v1584_v45  ;;  %v52_v60 = vld [vmem:[%s2010_s3] sm:$0xff] }
 0x294   :  { %v435_v63 = vpop.permute.xlu1 %434 }
 0x295   :  { %v1632_v0 = vmul.f32 0.5, %v420_v62  ;;  %v451_v1 = vadd.f32 %v435_v63, %v391_v46  ;;  %v469_v3 = vmul.f32 %v1629_v61, %v1629_v61 }
 0x296   :  { %v433_v2 = vpop.permute.xlu0 %432 }
 0x297   :  { %v463_v4 = vmul.f32 0.5, %v451_v1  ;;  %v450_v5 = vadd.f32 %v433_v2, %v390_v47  ;;  %v468_v7 = vmul.f32 %v1632_v0, %v1632_v0  ;;  %v59_v2 = vld [vmem:[%s2011_s4 + $0x8] sm:$0xff] }
 0x298   :  { %v409_v6 = vpop.permute.xlu1 %408 }
 0x299   :  { %v475_v8 = vsub.f32 %v463_v4, %v469_v3  ;;  %v462_v9 = vmul.f32 0.5, %v450_v5  ;;  %v423_v10 = vadd.f32 %v1593_v48, %v409_v6  ;;  %v58_v6 = vld [vmem:[%s2011_s4] sm:$0xff] }
 0x29a   :  { %v407_v11 = vpop.permute.xlu0 %406 }
 0x29b   :  { %v481_v12 = vmax.f32 %v475_v8, 0.0  ;;  %v474_v13 = vsub.f32 %v462_v9, %v468_v7  ;;  %v422_v14 = vadd.f32 %v407_v11, %v1598_v49  ;;  %v1640_v15 = vmul.f32 0.5, %v423_v10 }
 0x29c   :  { %v439_v16 = vpop.permute.xlu1 %438 }
 0x29d   :  { %v487_v17 = vadd.f32 1e-05, %v481_v12  ;;  %v480_v18 = vmax.f32 %v474_v13, 0.0  ;;  %v1642_v19 = vmul.f32 0.5, %v422_v14  ;;  %v453_v20 = vadd.f32 %v439_v16, %v393_v50  ;;  %v54_v13 = vld [vmem:[%s2010_s3 + $0x10] sm:$0xff] }
 0x29e   :  { %v437_v21 = vpop.permute.xlu0 %436  ;;  %v471_v24 = vmul.f32 %v1640_v15, %v1640_v15 }
 0x29f   :  { %1354 = vrsqrt.f32 %v487_v17  ;;  %v486_v22 = vadd.f32 1e-05, %v480_v18  ;;  %v452_v23 = vadd.f32 %v437_v21, %v392_v51  ;;  %v465_v25 = vmul.f32 0.5, %v453_v20  ;;  %v61_v20 = vld [vmem:[%s2011_s4 + $0x18] sm:$0xff] }
 0x2a0   :  { %v413_v26 = vpop.permute.xlu1 %412  ;;  %v470_v27 = vmul.f32 %v1642_v19, %v1642_v19 }
 0x2a1   :  { %1356 = vrsqrt.f32 %v486_v22  ;;  %v464_v28 = vmul.f32 0.5, %v452_v23  ;;  %v425_v29 = vadd.f32 %v1607_v52, %v413_v26  ;;  %v477_v30 = vsub.f32 %v465_v25, %v471_v24  ;;  %v60_v22 = vld [vmem:[%s2011_s4 + $0x10] sm:$0xff]  ;;  %v57_v26 = vld [vmem:[%s2010_s3 + $0x28] sm:$0xff] }
 0x2a2   :  { %v411_v31 = vpop.permute.xlu0 %410 }
 0x2a3   :  { %v476_v32 = vsub.f32 %v464_v28, %v470_v27  ;;  %v1649_v33 = vmul.f32 0.5, %v425_v29  ;;  %v424_v34 = vadd.f32 %v411_v31, %v1612_v53  ;;  %v483_v35 = vmax.f32 %v477_v30, 0.0  ;;  %v56_v30 = vld [vmem:[%s2010_s3 + $0x20] sm:$0xff] }
 0x2a4   :  { %v443_v36 = vpop.permute.xlu1 %442 }
 0x2a5   :  { %v482_v37 = vmax.f32 %v476_v32, 0.0  ;;  %v1652_v38 = vmul.f32 0.5, %v424_v34  ;;  %v455_v39 = vadd.f32 %v443_v36, %v395_v54  ;;  %v489_v40 = vadd.f32 1e-05, %v483_v35  ;;  %v63_v34 = vld [vmem:[%s2011_s4 + $0x28] sm:$0xff] }
 0x2a6   :  { %v441_v41 = vpop.permute.xlu0 %440  ;;  %v473_v43 = vmul.f32 %v1649_v33, %v1649_v33 }
 0x2a7   :  { %v488_v42 = vadd.f32 1e-05, %v482_v37  ;;  %v467_v46 = vmul.f32 0.5, %v455_v39  ;;  %v454_v47 = vadd.f32 %v441_v41, %v394_v55  ;;  %1358 = vrsqrt.f32 %v489_v40  ;;  %v62_v37 = vld [vmem:[%s2011_s4 + $0x20] sm:$0xff] }
 0x2a8   :  { %v472_v50 = vmul.f32 %v1652_v38, %v1652_v38 }
 0x2a9   :  { %1360 = vrsqrt.f32 %v488_v42  ;;  %v479_v51 = vsub.f32 %v467_v46, %v473_v43  ;;  %v466_v56 = vmul.f32 0.5, %v454_v47 }
 0x2ab   :  { %v485_v54 = vmax.f32 %v479_v51, 0.0  ;;  %v478_v58 = vsub.f32 %v466_v56, %v472_v50 }
 0x2ac   :  { %v1355_v59 = vpop.eup %1354 }
 0x2ad   :  { %v491_v62 = vadd.f32 1e-05, %v485_v54  ;;  %v484_v55 = vmax.f32 %v478_v58, 0.0  ;;  %v499_v63 = vmul.f32 %v1355_v59, %v53_v57 }
 0x2ae   :  { %v1357_v1 = vpop.eup %1356 }
 0x2af   :  { %1362 = vrsqrt.f32 %v491_v62  ;;  %v490_v3 = vadd.f32 1e-05, %v484_v55  ;;  %542 = vrot.lane.b32.xlu1 %v499_v63, %s1438_s15  ;;  %v498_v4 = vmul.f32 %v1357_v1, %v52_v60  ;;  %v505_v5 = vmul.f32 %v499_v63, %v1629_v61  ;;  %v55_v61 = vld [vmem:[%s2010_s3 + $0x18] sm:$0xff] }
 0x2b0   :  { %v517_v9 = vmul.f32 %v1580_v44, %v499_v63 }
 0x2b1   :  { %1364 = vrsqrt.f32 %v490_v3  ;;  %540 = vrot.lane.b32.xlu0 %v498_v4, %s1438_s15  ;;  %v511_v7 = vsub.f32 %v59_v2, %v505_v5  ;;  %v504_v8 = vmul.f32 %v498_v4, %v1632_v0  ;;  %v516_v11 = vmul.f32 %v498_v4, %v1584_v45 }
 0x2b3   :  { %572 = vrot.lane.b32.xlu1 %v511_v7, %s1438_s15  ;;  %v510_v10 = vsub.f32 %v58_v6, %v504_v8  ;;  %v523_v12 = vadd.f32 %v517_v9, %v511_v7 }
 0x2b4   :  { %v1359_v14 = vpop.eup %1358 }
 0x2b5   :  { %v522_v16 = vadd.f32 %v516_v11, %v510_v10  ;;  %570 = vrot.lane.b32.xlu0 %v510_v10, %s1438_s15  ;;  %v501_v17 = vmul.f32 %v1359_v14, %v55_v61 }
 0x2b6   :  { %v1361_v0 = vpop.eup %1360 }
 0x2b7   :  { %1366 = vtanh.f32 %v522_v16  ;;  %v500_v18 = vmul.f32 %v1361_v0, %v54_v13  ;;  %546 = vrot.lane.b32.xlu1 %v501_v17, %s1438_s15  ;;  %v507_v21 = vmul.f32 %v501_v17, %v1640_v15  ;;  %v519_v25 = vmul.f32 %v1593_v48, %v501_v17 }
 0x2b8   :  { %1368 = vtanh.f32 %v523_v12 }
 0x2b9   :  { %544 = vrot.lane.b32.xlu0 %v500_v18, %s1438_s15  ;;  %v506_v23 = vmul.f32 %v500_v18, %v1642_v19  ;;  %v513_v24 = vsub.f32 %v61_v20, %v507_v21  ;;  %v518_v28 = vmul.f32 %v500_v18, %v1598_v49 }
 0x2bb   :  { %v512_v27 = vsub.f32 %v60_v22, %v506_v23  ;;  %v525_v15 = vadd.f32 %v519_v25, %v513_v24  ;;  %576 = vrot.lane.b32.xlu1 %v513_v24, %s1438_s15 }
 0x2bc   :  { %v1363_v29 = vpop.eup %1362 }
 0x2bd   :  { %v524_v31 = vadd.f32 %v518_v28, %v512_v27  ;;  %574 = vrot.lane.b32.xlu0 %v512_v27, %s1438_s15  ;;  %v503_v19 = vmul.f32 %v1363_v29, %v57_v26 }
 0x2be   :  { %v1365_v32 = vpop.eup %1364 }
 0x2bf   :  { %1370 = vtanh.f32 %v524_v31  ;;  %v502_v35 = vmul.f32 %v1365_v32, %v56_v30  ;;  %v509_v36 = vmul.f32 %v503_v19, %v1649_v33  ;;  %550 = vrot.lane.b32.xlu1 %v503_v19, %s1438_s15  ;;  %v521_v41 = vmul.f32 %v1607_v52, %v503_v19 }
 0x2c0   :  { %1372 = vtanh.f32 %v525_v15 }
 0x2c1   :  { %548 = vrot.lane.b32.xlu0 %v502_v35, %s1438_s15  ;;  %v515_v39 = vsub.f32 %v63_v34, %v509_v36  ;;  %v508_v40 = vmul.f32 %v502_v35, %v1652_v38  ;;  %v520_v43 = vmul.f32 %v502_v35, %v1612_v53  ;;  %v66_v34 = vld [vmem:[%s2012_s6] sm:$0xff] }
 0x2c2   :  { %1343 = vmatprep.mubr.msk.f32.mxu0 %vm276_vm1, %v66_v34 }
 0x2c3   :  { %v514_v42 = vsub.f32 %v62_v37, %v508_v40  ;;  %580 = vrot.lane.b32.xlu1 %v515_v39, %s1438_s15  ;;  %v527_v33 = vadd.f32 %v521_v41, %v515_v39 }
 0x2c4   :  { %v1367_v46 = vpop.eup %1366 }
 0x2c5   :  { %v1369_v47 = vpop.eup %1368  ;;  %1313 = vmatprep.mubr.msk.f32.mxu1 %vm84_vm0, %v1367_v46  ;;  %578 = vrot.lane.b32.xlu0 %v514_v42, %s1438_s15  ;;  %v526_v50 = vadd.f32 %v520_v43, %v514_v42 }
 0x2c6   :  { %1314 = vmatmul.mubr.msk.f32.vlgmr.msra.gmra.mxu1 %vm84_vm0, %v1369_v47 }
 0x2c7   :  { %1374 = vtanh.f32 %v526_v50 }
 0x2c8   :  { %1376 = vtanh.f32 %v527_v33 }
 0x2cc   :  { %v1371_v38 = vpop.eup %1370 }
 0x2cd   :  { %v1373_v51 = vpop.eup %1372  ;;  %1316 = vmatprep.mubr.msk.f32.mxu1 %vm84_vm0, %v1371_v38 }
 0x2ce   :  { %1317 = vmatmul.mubr.msk.f32.gmra.mxu1 %vm84_vm0, %v1373_v51  ;;  %v67_v51 = vld [vmem:[%s2012_s6 + $0x8] sm:$0xff] }
 0x2d4   :  { %v1375_v56 = vpop.eup %1374 }
 0x2d5   :  { %v1377_v57 = vpop.eup %1376  ;;  %1319 = vmatprep.mubr.msk.f32.mxu1 %vm84_vm0, %v1375_v56  ;;  %v68_v56 = vld [vmem:[%s2012_s6 + $0x10] sm:$0xff] }
 0x2d6   :  { %1320 = vmatmul.mubr.msk.f32.gmra.mxu1 %vm84_vm0, %v1377_v57  ;;  %v69_v57 = vld [vmem:[%s2012_s6 + $0x18] sm:$0xff] }
 0x321   :  { %v543_v54 = vpop.permute.xlu1 %542 }
 0x322   :  { %v559_v59 = vmul.f32 %v1580_v44, %v543_v54  ;;  %v70_v54 = vld [vmem:[%s2012_s6 + $0x20] sm:$0xff] }
 0x323   :  { %v541_v58 = vpop.permute.xlu0 %540 }
 0x324   :  { %v558_v62 = vmul.f32 %v541_v58, %v1584_v45  ;;  %v71_v58 = vld [vmem:[%s2012_s6 + $0x28] sm:$0xff] }
 0x325   :  { %v573_v60 = vpop.permute.xlu1 %572 }
 0x326   :  { %v589_v55 = vadd.f32 %v573_v60, %v559_v59 }
 0x327   :  { %v571_v63 = vpop.permute.xlu0 %570 }
 0x328   :  { %1378 = vtanh.f32 %v589_v55  ;;  %v588_v1 = vadd.f32 %v571_v63, %v558_v62 }
 0x329   :  { %v547_v2 = vpop.permute.xlu1 %546 }
 0x32a   :  { %1380 = vtanh.f32 %v588_v1  ;;  %v561_v4 = vmul.f32 %v1593_v48, %v547_v2 }
 0x32b   :  { %v545_v3 = vpop.permute.xlu0 %544 }
 0x32c   :  { %v560_v5 = vmul.f32 %v545_v3, %v1598_v49 }
 0x32d   :  { %v577_v6 = vpop.permute.xlu1 %576 }
 0x32e   :  { %v591_v7 = vadd.f32 %v577_v6, %v561_v4 }
 0x32f   :  { %v575_v8 = vpop.permute.xlu0 %574 }
 0x330   :  { %v590_v9 = vadd.f32 %v575_v8, %v560_v5  ;;  %1382 = vtanh.f32 %v591_v7 }
 0x331   :  { %v551_v44 = vpop.permute.xlu1 %550 }
 0x332   :  { %1384 = vtanh.f32 %v590_v9  ;;  %v563_v11 = vmul.f32 %v1607_v52, %v551_v44 }
 0x333   :  { %v549_v10 = vpop.permute.xlu0 %548 }
 0x334   :  { %v562_v61 = vmul.f32 %v549_v10, %v1612_v53 }
 0x335   :  { %v1379_v45 = vpop.eup %1378  ;;  %v581_v12 = vpop.permute.xlu1 %580 }
 0x336   :  { %608 = vrot.lane.b32.xlu1 %v1379_v45, %s1439_s27  ;;  %v593_v48 = vadd.f32 %v581_v12, %v563_v11 }
 0x337   :  { %v1381_v13 = vpop.eup %1380  ;;  %v579_v14 = vpop.permute.xlu0 %578 }
 0x338   :  { %v592_v49 = vadd.f32 %v579_v14, %v562_v61  ;;  %606 = vrot.lane.b32.xlu0 %v1381_v13, %s1439_s27  ;;  %1386 = vtanh.f32 %v593_v48 }
 0x33a   :  { %1388 = vtanh.f32 %v592_v49 }
 0x33d   :  { %v1383_v16 = vpop.eup %1382 }
 0x33e   :  { %612 = vrot.lane.b32.xlu1 %v1383_v16, %s1439_s27 }
 0x33f   :  { %v1385_v0 = vpop.eup %1384 }
 0x340   :  { %610 = vrot.lane.b32.xlu0 %v1385_v0, %s1439_s27 }
 0x345   :  { %v1387_v52 = vpop.eup %1386 }
 0x346   :  { %616 = vrot.lane.b32.xlu1 %v1387_v52, %s1439_s27 }
 0x347   :  { %v1389_v17 = vpop.eup %1388 }
 0x348   :  { %614 = vrot.lane.b32.xlu0 %v1389_v17, %s1439_s27 }
 0x386   :  { %v1315_v24 = vpop.f32.mrf.mxu1 }
 0x388   :  { %v714_v25 = vpop.f32.mrf.mxu1 }
 0x38e   :  { %v1318_v26 = vpop.f32.mrf.mxu1 }
 0x390   :  { %v724_v27 = vpop.f32.mrf.mxu1 }
 0x396   :  { %v1321_v28 = vpop.f32.mrf.mxu1 }
 0x398   :  { %v734_v29 = vpop.f32.mrf.mxu1 }
 0x3a8   :  { %v609_v18 = vpop.permute.xlu1 %608 }
 0x3aa   :  { %v607_v53 = vpop.permute.xlu0 %606 }
 0x3ab   :  { %1322 = vmatprep.mubr.msk.f32.mxu1 %vm84_vm0, %v607_v53 }
 0x3ac   :  { %1323 = vmatmul.mubr.msk.f32.gmra.mxu1 %vm84_vm0, %v609_v18 }
 0x3b0   :  { %v613_v21 = vpop.permute.xlu1 %612 }
 0x3b2   :  { %v611_v20 = vpop.permute.xlu0 %610 }
 0x3b3   :  { %1325 = vmatprep.mubr.msk.f32.mxu1 %vm84_vm0, %v611_v20 }
 0x3b4   :  { %1326 = vmatmul.mubr.msk.f32.gmra.mxu1 %vm84_vm0, %v613_v21 }
 0x3b8   :  { %v617_v23 = vpop.permute.xlu1 %616 }
 0x3ba   :  { %v615_v22 = vpop.permute.xlu0 %614 }
 0x3bb   :  { %1328 = vmatprep.mubr.msk.f32.mxu1 %vm84_vm0, %v615_v22 }
 0x3bc   :  { %1329 = vmatmul.mubr.msk.f32.gmra.mxu1 %vm84_vm0, %v617_v23 }
 0x46c   :  { %v1324_v15 = vpop.f32.mrf.mxu1 }
 0x46e   :  { %v744_v30 = vpop.f32.mrf.mxu1 }
 0x474   :  { %v1327_v31 = vpop.f32.mrf.mxu1 }
 0x476   :  { %v754_v19 = vpop.f32.mrf.mxu1 }
 0x47c   :  { %v1330_v32 = vpop.f32.mrf.mxu1 }
 0x47d   :  { %789 = vrot.lane.b32.xlu0 %v1330_v32, %s1438_s15 }
 0x47e   :  { %v764_v35 = vpop.f32.mrf.mxu1 }
 0x47f   :  { %787 = vrot.lane.b32.xlu1 %v764_v35, %s1438_s15 }
 0x481   :  { %785 = vrot.lane.b32.xlu0 %v1327_v31, %s1438_s15 }
 0x483   :  { %783 = vrot.lane.b32.xlu1 %v754_v19, %s1438_s15 }
 0x485   :  { %781 = vrot.lane.b32.xlu0 %v1324_v15, %s1438_s15 }
 0x487   :  { %779 = vrot.lane.b32.xlu1 %v744_v30, %s1438_s15 }
 0x4ef   :  { %v790_v36 = vpop.permute.xlu0 %789 }
 0x4f0   :  { %v802_v37 = vsel %vm84_vm0, %v1321_v28, %v790_v36 }
 0x4f1   :  { %1331 = vmatprep.subr.mxu0 %v802_v37  ;;  %v788_v39 = vpop.permute.xlu1 %787 }
 0x4f2   :  { %1332 = vmatpush3.msra.mxu0 %v802_v37  ;;  %v801_v40 = vsel %vm84_vm0, %v734_v29, %v788_v39 }
 0x4f3   :  { %v786_v41 = vpop.permute.xlu0 %785  ;;  %1333 = vmatprep.subr.mxu0 %v801_v40 }
 0x4f4   :  { %1334 = vmatpush3.msra.mxu0 %v801_v40  ;;  %v800_v42 = vsel %vm84_vm0, %v1318_v26, %v786_v41 }
 0x4f5   :  { %1335 = vmatprep.subr.mxu0 %v800_v42  ;;  %v784_v43 = vpop.permute.xlu1 %783 }
 0x4f6   :  { %1336 = vmatpush3.msra.mxu0 %v800_v42  ;;  %v799_v46 = vsel %vm84_vm0, %v724_v27, %v784_v43 }
 0x4f7   :  { %v782_v33 = vpop.permute.xlu0 %781  ;;  %1337 = vmatprep.subr.mxu0 %v799_v46 }
 0x4f8   :  { %1338 = vmatpush3.msra.mxu0 %v799_v46  ;;  %v798_v47 = vsel %vm84_vm0, %v1315_v24, %v782_v33 }
 0x4f9   :  { %1339 = vmatprep.subr.mxu0 %v798_v47  ;;  %v780_v50 = vpop.permute.xlu1 %779 }
 0x4fa   :  { %1340 = vmatpush3.msra.mxu0 %v798_v47  ;;  %v797_v38 = vsel %vm84_vm0, %v714_v25, %v780_v50 }
 0x4fb   :  { %1341 = vmatprep.subr.mxu0 %v797_v38 }
 0x4fc   :  { %1342 = vmatpush3.msra.mxu0 %v797_v38 }
 0x4fd   :  { %1344 = vmatmul.mubr.msk.f32.vlgmr.msra.gmra.mxu0 %vm276_vm1, %v67_v51 }
 0x4fe   :  { %1346 = vmatprep.mubr.msk.f32.mxu0 %vm276_vm1, %v68_v56 }
 0x501   :  { %1347 = vmatmul.mubr.msk.f32.gmra.mxu0 %vm276_vm1, %v69_v57 }
 0x502   :  { %1349 = vmatprep.mubr.msk.f32.mxu0 %vm276_vm1, %v70_v54 }
 0x505   :  { %1350 = vmatmul.mubr.msk.f32.gmra.mxu0 %vm276_vm1, %v71_v58 }
 0x5bd   :  { %v1778_v59 = vpop.f32.mrf.mxu0 }
 0x5be   :  { %930 = vrot.lane.b32.xlu1 %v1778_v59, %s1439_s27  ;;  %v917_v62 = vmul.f32 %v1778_v59, %v1778_v59 }
 0x5bf   :  { %v1782_v60 = vpop.f32.mrf.mxu0 }
 0x5c0   :  { %928 = vrot.lane.b32.xlu0 %v1782_v60, %s1439_s27  ;;  %v916_v55 = vmul.f32 %v1782_v60, %v1782_v60 }
 0x5c1   :  { %v1791_v63 = vpop.f32.mrf.mxu0 }
 0x5c2   :  { %960 = vrot.lane.b32.xlu1 %v917_v62, %s1439_s27  ;;  %v919_v2 = vmul.f32 %v1791_v63, %v1791_v63 }
 0x5c3   :  { %v1796_v1 = vpop.f32.mrf.mxu0 }
 0x5c4   :  { %958 = vrot.lane.b32.xlu0 %v916_v55, %s1439_s27  ;;  %v918_v3 = vmul.f32 %v1796_v1, %v1796_v1 }
 0x5c5   :  { %v1805_v4 = vpop.f32.mrf.mxu0 }
 0x5c6   :  { %934 = vrot.lane.b32.xlu1 %v1791_v63, %s1439_s27  ;;  %v921_v6 = vmul.f32 %v1805_v4, %v1805_v4 }
 0x5c7   :  { %v1810_v5 = vpop.f32.mrf.mxu0 }
 0x5c8   :  { %932 = vrot.lane.b32.xlu0 %v1796_v1, %s1439_s27  ;;  %v920_v7 = vmul.f32 %v1810_v5, %v1810_v5 }
 0x5ca   :  { %964 = vrot.lane.b32.xlu1 %v919_v2, %s1439_s27 }
 0x5cc   :  { %962 = vrot.lane.b32.xlu0 %v918_v3, %s1439_s27 }
 0x5ce   :  { %938 = vrot.lane.b32.xlu1 %v1805_v4, %s1439_s27 }
 0x5d0   :  { %936 = vrot.lane.b32.xlu0 %v1810_v5, %s1439_s27 }
 0x5d2   :  { %968 = vrot.lane.b32.xlu1 %v921_v6, %s1439_s27 }
 0x5d4   :  { %966 = vrot.lane.b32.xlu0 %v920_v7, %s1439_s27 }
 0x630   :  { %v931_v8 = vpop.permute.xlu1 %930 }
 0x631   :  { %v947_v9 = vadd.f32 %v1778_v59, %v931_v8 }
 0x632   :  { %v929_v44 = vpop.permute.xlu0 %928 }
 0x633   :  { %v1821_v10 = vmul.f32 0.5, %v947_v9  ;;  %v946_v45 = vadd.f32 %v929_v44, %v1782_v60  ;;  %v72_v44 = vld [vmem:[%s2013_s7] sm:$0xff] }
 0x634   :  { %v961_v11 = vpop.permute.xlu1 %960 }
 0x635   :  { %v1824_v61 = vmul.f32 0.5, %v946_v45  ;;  %v977_v12 = vadd.f32 %v961_v11, %v917_v62  ;;  %v995_v48 = vmul.f32 %v1821_v10, %v1821_v10 }
 0x636   :  { %v959_v13 = vpop.permute.xlu0 %958 }
 0x637   :  { %v989_v14 = vmul.f32 0.5, %v977_v12  ;;  %v976_v49 = vadd.f32 %v959_v13, %v916_v55  ;;  %v994_v0 = vmul.f32 %v1824_v61, %v1824_v61  ;;  %v79_v13 = vld [vmem:[%s2014_s8 + $0x8] sm:$0xff] }
 0x638   :  { %v935_v16 = vpop.permute.xlu1 %934 }
 0x639   :  { %v1001_v52 = vsub.f32 %v989_v14, %v995_v48  ;;  %v988_v17 = vmul.f32 0.5, %v976_v49  ;;  %v949_v53 = vadd.f32 %v1791_v63, %v935_v16  ;;  %v78_v16 = vld [vmem:[%s2014_s8] sm:$0xff] }
 0x63a   :  { %v933_v18 = vpop.permute.xlu0 %932 }
 0x63b   :  { %v1007_v20 = vmax.f32 %v1001_v52, 0.0  ;;  %v1000_v21 = vsub.f32 %v988_v17, %v994_v0  ;;  %v948_v22 = vadd.f32 %v933_v18, %v1796_v1  ;;  %v1832_v23 = vmul.f32 0.5, %v949_v53  ;;  %v75_v53 = vld [vmem:[%s2013_s7 + $0x18] sm:$0xff] }
 0x63c   :  { %v965_v24 = vpop.permute.xlu1 %964 }
 0x63d   :  { %v1013_v25 = vadd.f32 1e-05, %v1007_v20  ;;  %v1006_v26 = vmax.f32 %v1000_v21, 0.0  ;;  %v1834_v27 = vmul.f32 0.5, %v948_v22  ;;  %v979_v28 = vadd.f32 %v965_v24, %v919_v2  ;;  %v74_v21 = vld [vmem:[%s2013_s7 + $0x10] sm:$0xff] }
 0x63e   :  { %v963_v29 = vpop.permute.xlu0 %962  ;;  %v997_v31 = vmul.f32 %v1832_v23, %v1832_v23 }
 0x63f   :  { %1390 = vrsqrt.f32 %v1013_v25  ;;  %v1012_v15 = vadd.f32 1e-05, %v1006_v26  ;;  %v978_v30 = vadd.f32 %v963_v29, %v918_v3  ;;  %v991_v19 = vmul.f32 0.5, %v979_v28  ;;  %v73_v3 = vld [vmem:[%s2013_s7 + $0x8] sm:$0xff] }
 0x640   :  { %v939_v32 = vpop.permute.xlu1 %938  ;;  %v996_v34 = vmul.f32 %v1834_v27, %v1834_v27 }
 0x641   :  { %1392 = vrsqrt.f32 %v1012_v15  ;;  %v990_v35 = vmul.f32 0.5, %v978_v30  ;;  %v951_v36 = vadd.f32 %v1805_v4, %v939_v32  ;;  %v1003_v37 = vsub.f32 %v991_v19, %v997_v31  ;;  %v80_v15 = vld [vmem:[%s2014_s8 + $0x10] sm:$0xff]  ;;  %v77_v31 = vld [vmem:[%s2013_s7 + $0x28] sm:$0xff] }
 0x642   :  { %v937_v39 = vpop.permute.xlu0 %936 }
 0x643   :  { %v1002_v40 = vsub.f32 %v990_v35, %v996_v34  ;;  %v1841_v41 = vmul.f32 0.5, %v951_v36  ;;  %v950_v42 = vadd.f32 %v937_v39, %v1810_v5  ;;  %v1009_v43 = vmax.f32 %v1003_v37, 0.0 }
 0x644   :  { %v969_v46 = vpop.permute.xlu1 %968 }
 0x645   :  { %v1008_v33 = vmax.f32 %v1002_v40, 0.0  ;;  %v1844_v47 = vmul.f32 0.5, %v950_v42  ;;  %v981_v50 = vadd.f32 %v969_v46, %v921_v6  ;;  %v1015_v38 = vadd.f32 1e-05, %v1009_v43  ;;  %v83_v42 = vld [vmem:[%s2014_s8 + $0x28] sm:$0xff] }
 0x646   :  { %v967_v51 = vpop.permute.xlu0 %966  ;;  %v999_v57 = vmul.f32 %v1841_v41, %v1841_v41 }
 0x647   :  { %v1014_v56 = vadd.f32 1e-05, %v1008_v33  ;;  %v993_v54 = vmul.f32 0.5, %v981_v50  ;;  %v980_v58 = vadd.f32 %v967_v51, %v920_v7  ;;  %1394 = vrsqrt.f32 %v1015_v38  ;;  %v82_v33 = vld [vmem:[%s2014_s8 + $0x20] sm:$0xff] }
 0x648   :  { %v998_v62 = vmul.f32 %v1844_v47, %v1844_v47 }
 0x649   :  { %1396 = vrsqrt.f32 %v1014_v56  ;;  %v1005_v55 = vsub.f32 %v993_v54, %v999_v57  ;;  %v992_v2 = vmul.f32 0.5, %v980_v58  ;;  %v1426_v57 = vld [vmem:[%s2007_s0 + $0x8] sm:$0xff] }
 0x64b   :  { %v1011_v6 = vmax.f32 %v1005_v55, 0.0  ;;  %v1004_v8 = vsub.f32 %v992_v2, %v998_v62 }
 0x64c   :  { %v1391_v9 = vpop.eup %1390 }
 0x64d   :  { %v1017_v45 = vadd.f32 1e-05, %v1011_v6  ;;  %v1010_v7 = vmax.f32 %v1004_v8, 0.0  ;;  %v1025_v11 = vmul.f32 %v1391_v9, %v73_v3  ;;  %v1428_v9 = vld [vmem:[%s2007_s0 + $0x18] sm:$0xff] }
 0x64e   :  { %v1393_v12 = vpop.eup %1392 }
 0x64f   :  { %1398 = vrsqrt.f32 %v1017_v45  ;;  %v1016_v48 = vadd.f32 1e-05, %v1010_v7  ;;  %1068 = vrot.lane.b32.xlu1 %v1025_v11, %s1438_s15  ;;  %v1024_v14 = vmul.f32 %v1393_v12, %v72_v44  ;;  %v1031_v49 = vmul.f32 %v1025_v11, %v1821_v10  ;;  %v1429_v45 = vld [vmem:[%s2007_s0 + $0x10] sm:$0xff]  ;;  %v1430_v12 = vld [vmem:[%s2007_s0 + $0x28] sm:$0xff] }
 0x650   :  { %v1043_v52 = vmul.f32 %v1778_v59, %v1025_v11 }
 0x651   :  { %1400 = vrsqrt.f32 %v1016_v48  ;;  %1066 = vrot.lane.b32.xlu0 %v1024_v14, %s1438_s15  ;;  %v1037_v0 = vsub.f32 %v79_v13, %v1031_v49  ;;  %v1030_v17 = vmul.f32 %v1024_v14, %v1824_v61  ;;  %v1042_v10 = vmul.f32 %v1024_v14, %v1782_v60  ;;  %v81_v61 = vld [vmem:[%s2014_s8 + $0x18] sm:$0xff]  ;;  %v1431_v14 = vld [vmem:[%s2007_s0 + $0x20] sm:$0xff] }
 0x653   :  { %v1049_v18 = vadd.f32 %v1043_v52, %v1037_v0  ;;  %v1036_v20 = vsub.f32 %v78_v16, %v1030_v17 }
 0x654   :  { %v1395_v22 = vpop.eup %1394 }
 0x655   :  { %1402 = vtanh.f32 %v1049_v18  ;;  %v1048_v24 = vadd.f32 %v1042_v10, %v1036_v20  ;;  %v1027_v26 = vmul.f32 %v1395_v22, %v75_v53 }
 0x656   :  { %v1397_v25 = vpop.eup %1396 }
 0x657   :  { %v1026_v28 = vmul.f32 %v1397_v25, %v74_v21  ;;  %1404 = vtanh.f32 %v1048_v24  ;;  %1072 = vrot.lane.b32.xlu1 %v1027_v26, %s1438_s15  ;;  %v1033_v29 = vmul.f32 %v1027_v26, %v1832_v23  ;;  %v1045_v32 = vmul.f32 %v1791_v63, %v1027_v26  ;;  %v76_v23 = vld [vmem:[%s2013_s7 + $0x20] sm:$0xff] }
 0x659   :  { %1070 = vrot.lane.b32.xlu0 %v1026_v28, %s1438_s15  ;;  %v1032_v30 = vmul.f32 %v1026_v28, %v1834_v27  ;;  %v1039_v19 = vsub.f32 %v81_v61, %v1033_v29  ;;  %v1044_v35 = vmul.f32 %v1026_v28, %v1796_v1 }
 0x65b   :  { %v1038_v34 = vsub.f32 %v80_v15, %v1032_v30  ;;  %1098 = vrot.lane.b32.xlu1 %v1037_v0, %s1438_s15  ;;  %v1051_v37 = vadd.f32 %v1045_v32, %v1039_v19 }
 0x65c   :  { %v1399_v36 = vpop.eup %1398 }
 0x65d   :  { %1096 = vrot.lane.b32.xlu0 %v1036_v20, %s1438_s15  ;;  %v1029_v27 = vmul.f32 %v1399_v36, %v77_v31  ;;  %v1050_v39 = vadd.f32 %v1044_v35, %v1038_v34  ;;  %1406 = vtanh.f32 %v1051_v37  ;;  %v1432_v37 = vld [vmem:[%s2007_s0 + $0x38] sm:$0xff] }
 0x65e   :  { %v1401_v40 = vpop.eup %1400 }
 0x65f   :  { %v1028_v43 = vmul.f32 %v1401_v40, %v76_v23  ;;  %1408 = vtanh.f32 %v1050_v39  ;;  %v1035_v46 = vmul.f32 %v1029_v27, %v1841_v41  ;;  %1076 = vrot.lane.b32.xlu1 %v1029_v27, %s1438_s15  ;;  %v1047_v38 = vmul.f32 %v1805_v4, %v1029_v27  ;;  %v1433_v40 = vld [vmem:[%s2007_s0 + $0x30] sm:$0xff] }
 0x661   :  { %1074 = vrot.lane.b32.xlu0 %v1028_v43, %s1438_s15  ;;  %v1041_v50 = vsub.f32 %v83_v42, %v1035_v46  ;;  %v1034_v51 = vmul.f32 %v1028_v43, %v1844_v47  ;;  %v1046_v62 = vmul.f32 %v1028_v43, %v1810_v5  ;;  %v1427_v47 = vld [vmem:[%s2007_s0] sm:$0xff]  ;;  %v1434_v46 = vld [vmem:[%s2007_s0 + $0x48] sm:$0xff] }
 0x662   :  { %v1403_v56 = vpop.eup %1402 }
 0x663   :  { %v1151_v54 = vadd.f32 %v1426_v57, %v1403_v56  ;;  %v1053_v41 = vadd.f32 %v1047_v38, %v1041_v50  ;;  %v1040_v58 = vsub.f32 %v82_v33, %v1034_v51  ;;  %1102 = vrot.lane.b32.xlu1 %v1039_v19, %s1438_s15  ;;  %v1435_v38 = vld [vmem:[%s2007_s0 + $0x40] sm:$0xff]  ;;  %v1436_v57 = vld [vmem:[%s2007_s0 + $0x58] sm:$0xff] }
 0x664   :  { %v1405_v55 = vpop.eup %1404 }
 0x665   :  { %1163 = vst.msk [vmem:[%s2015_s9 + $0x8] sm:$0xff] %vm84_vm0, %v1151_v54  ;;  %v1150_v2 = vadd.f32 %v1427_v47, %v1405_v55  ;;  %1100 = vrot.lane.b32.xlu0 %v1038_v34, %s1438_s15  ;;  %1410 = vtanh.f32 %v1053_v41  ;;  %v1052_v3 = vadd.f32 %v1046_v62, %v1040_v58 }
 0x667   :  { %1162 = vst.msk [vmem:[%s2015_s9] sm:$0xff] %vm84_vm0, %v1150_v2  ;;  %1412 = vtanh.f32 %v1052_v3  ;;  %1106 = vrot.lane.b32.xlu1 %v1041_v50, %s1438_s15 }
 0x669   :  { %1104 = vrot.lane.b32.xlu0 %v1040_v58, %s1438_s15  ;;  %v1437_v58 = vld [vmem:[%s2007_s0 + $0x50] sm:$0xff] }
 0x66a   :  { %v1407_v6 = vpop.eup %1406 }
 0x66b   :  { %v1153_v44 = vadd.f32 %v1428_v9, %v1407_v6 }
 0x66c   :  { %v1409_v8 = vpop.eup %1408 }
 0x66d   :  { %v1152_v7 = vadd.f32 %v1429_v45, %v1409_v8  ;;  %1165 = vst.msk [vmem:[%s2015_s9 + $0x18] sm:$0xff] %vm84_vm0, %v1153_v44 }
 0x66f   :  { %1164 = vst.msk [vmem:[%s2015_s9 + $0x10] sm:$0xff] %vm84_vm0, %v1152_v7 }
 0x672   :  { %v1411_v11 = vpop.eup %1410 }
 0x673   :  { %v1155_v13 = vadd.f32 %v1430_v12, %v1411_v11 }
 0x674   :  { %v1413_v48 = vpop.eup %1412 }
 0x675   :  { %1167 = vst.msk [vmem:[%s2015_s9 + $0x28] sm:$0xff] %vm84_vm0, %v1155_v13  ;;  %v1154_v49 = vadd.f32 %v1431_v14, %v1413_v48 }
 0x677   :  { %1166 = vst.msk [vmem:[%s2015_s9 + $0x20] sm:$0xff] %vm84_vm0, %v1154_v49 }
 0x6c1   :  { %v1069_v16 = vpop.permute.xlu1 %1068 }
 0x6c2   :  { %v1085_v53 = vmul.f32 %v1778_v59, %v1069_v16 }
 0x6c3   :  { %v1067_v0 = vpop.permute.xlu0 %1066 }
 0x6c4   :  { %v1084_v18 = vmul.f32 %v1067_v0, %v1782_v60 }
 0x6c9   :  { %v1073_v52 = vpop.permute.xlu1 %1072 }
 0x6ca   :  { %v1087_v26 = vmul.f32 %v1791_v63, %v1073_v52 }
 0x6cb   :  { %v1071_v17 = vpop.permute.xlu0 %1070 }
 0x6cc   :  { %v1086_v28 = vmul.f32 %v1071_v17, %v1796_v1 }
 0x6cd   :  { %v1099_v20 = vpop.permute.xlu1 %1098 }
 0x6ce   :  { %v1115_v10 = vadd.f32 %v1099_v20, %v1085_v53 }
 0x6cf   :  { %v1097_v21 = vpop.permute.xlu0 %1096 }
 0x6d0   :  { %v1114_v22 = vadd.f32 %v1097_v21, %v1084_v18  ;;  %1414 = vtanh.f32 %v1115_v10 }
 0x6d1   :  { %v1077_v24 = vpop.permute.xlu1 %1076 }
 0x6d2   :  { %1416 = vtanh.f32 %v1114_v22  ;;  %v1089_v59 = vmul.f32 %v1805_v4, %v1077_v24 }
 0x6d3   :  { %v1075_v25 = vpop.permute.xlu0 %1074 }
 0x6d4   :  { %v1088_v60 = vmul.f32 %v1075_v25, %v1810_v5 }
 0x6d5   :  { %v1103_v61 = vpop.permute.xlu1 %1102 }
 0x6d6   :  { %v1117_v29 = vadd.f32 %v1103_v61, %v1087_v26 }
 0x6d7   :  { %v1101_v15 = vpop.permute.xlu0 %1100 }
 0x6d8   :  { %v1116_v30 = vadd.f32 %v1101_v15, %v1086_v28  ;;  %1418 = vtanh.f32 %v1117_v29 }
 0x6d9   :  { %v1107_v31 = vpop.permute.xlu1 %1106 }
 0x6da   :  { %1420 = vtanh.f32 %v1116_v30  ;;  %v1119_v19 = vadd.f32 %v1107_v31, %v1089_v59 }
 0x6db   :  { %v1105_v32 = vpop.permute.xlu0 %1104 }
 0x6dc   :  { %v1118_v34 = vadd.f32 %v1105_v32, %v1088_v60  ;;  %1422 = vtanh.f32 %v1119_v19 }
 0x6dd   :  { %v1415_v35 = vpop.eup %1414 }
 0x6de   :  { %1424 = vtanh.f32 %v1118_v34  ;;  %1134 = vrot.lane.b32.xlu1 %v1415_v35, %s1439_s27 }
 0x6df   :  { %v1417_v63 = vpop.eup %1416 }
 0x6e0   :  { %1132 = vrot.lane.b32.xlu0 %v1417_v63, %s1439_s27 }
 0x6e5   :  { %v1419_v1 = vpop.eup %1418 }
 0x6e6   :  { %1138 = vrot.lane.b32.xlu1 %v1419_v1, %s1439_s27 }
 0x6e7   :  { %v1421_v36 = vpop.eup %1420 }
 0x6e8   :  { %1136 = vrot.lane.b32.xlu0 %v1421_v36, %s1439_s27 }
 0x6e9   :  { %v1423_v4 = vpop.eup %1422 }
 0x6ea   :  { %1142 = vrot.lane.b32.xlu1 %v1423_v4, %s1439_s27 }
 0x6eb   :  { %v1425_v5 = vpop.eup %1424 }
 0x6ec   :  { %1140 = vrot.lane.b32.xlu0 %v1425_v5, %s1439_s27 }
 0x750   :  { %v1135_v23 = vpop.permute.xlu1 %1134 }
 0x751   :  { %v1157_v27 = vadd.f32 %v1432_v37, %v1135_v23 }
 0x752   :  { %v1133_v39 = vpop.permute.xlu0 %1132 }
 0x753   :  { %v1156_v42 = vadd.f32 %v1433_v40, %v1133_v39  ;;  %1169 = vst.msk [vmem:[%s2015_s9 + $0x38] sm:$0xff] %vm84_vm0, %v1157_v27 }
 0x755   :  { %1168 = vst.msk [vmem:[%s2015_s9 + $0x30] sm:$0xff] %vm84_vm0, %v1156_v42 }
 0x758   :  { %v1139_v43 = vpop.permute.xlu1 %1138 }
 0x759   :  { %v1159_v33 = vadd.f32 %v1434_v46, %v1139_v43 }
 0x75a   :  { %v1137_v50 = vpop.permute.xlu0 %1136 }
 0x75b   :  { %v1158_v51 = vadd.f32 %v1435_v38, %v1137_v50  ;;  %1171 = vst.msk [vmem:[%s2015_s9 + $0x48] sm:$0xff] %vm84_vm0, %v1159_v33 }
 0x75c   :  { %v1143_v56 = vpop.permute.xlu1 %1142 }
 0x75d   :  { %1170 = vst.msk [vmem:[%s2015_s9 + $0x40] sm:$0xff] %vm84_vm0, %v1158_v51  ;;  %v1161_v54 = vadd.f32 %v1436_v57, %v1143_v56 }
 0x75e   :  { %v1141_v41 = vpop.permute.xlu0 %1140 }
 0x75f   :  { %v1160_v62 = vadd.f32 %v1437_v58, %v1141_v41  ;;  %1173 = vst.msk [vmem:[%s2015_s9 + $0x58] sm:$0xff] %vm84_vm0, %v1161_v54 }
 0x761   :  { %1172 = vst.msk [vmem:[%s2015_s9 + $0x50] sm:$0xff] %vm84_vm0, %v1160_v62 }

</bundles_post_ra>
